<compile_context>
chip_gen: v5e
topology: v5e:2x2
jax: 0.10.0
libtpu: 0.0.40
codegen_flags: <defaults>
</compile_context>

<pallas_src>
import numpy as np
import jax
import jax.numpy as jnp
from jax.experimental import pallas as pl
from jax.experimental.pallas import tpu as pltpu


def _sublane_multiple(itemsize):
    """Native second-minor tile: 8 rows for 4-byte, 16 for 2-byte, 32 for 1-byte."""
    return max(8, 32 // max(int(itemsize), 1))


def _vmem_budget_bytes():
    """(per-step tile budget, vmem_limit_bytes) derived from the chip's VMEM."""
    try:
        cap = int(pltpu.get_tpu_info().vmem_capacity_bytes)
    except Exception:
        cap = 64 * 1024 * 1024  # conservative fallback (v7x per-core VMEM)
    tile_budget = min(cap // 4, 16 * 1024 * 1024)
    vmem_limit = min(cap // 2, 64 * 1024 * 1024)
    return tile_budget, vmem_limit


def _pick_batch_tile(batch, feat, num_out, itemsize, sublane, budget):
    """Largest sublane-aligned batch tile within the VMEM budget, >=2 grid steps."""
    if batch <= sublane:
        return batch  # single block == full array dims (allowed by the (8,128) rule)
    tm = min(batch, 2048)
    tm -= tm % sublane

    def step_bytes(t):  # double-buffered input + output tiles
        return 2 * t * (feat + num_out) * itemsize

    while tm > sublane and step_bytes(tm) > budget:
        tm = max(sublane, (tm // 2) - ((tm // 2) % sublane))

    # v7x megacore: keep at least 2 parallel grid steps whenever batch allows.
    if batch >= 2 * sublane:
        half = -(-batch // 2)                    # ceil(batch / 2)
        half = -(-half // sublane) * sublane     # round up to sublane multiple
        tm = min(tm, half)
    return max(tm, sublane)


def _contiguous_groups(idx):
    """Coalesce static indices into (out_start, src_start, width) contiguous runs."""
    groups = []
    n = len(idx)
    i = 0
    while i < n:
        j = i + 1
        while j < n and idx[j] == idx[j - 1] + 1:
            j += 1
        groups.append((i, int(idx[i]), j - i))
        i = j
    return groups


def _make_gather_kernel(groups):
    """Static lane-gather: copy contiguous source runs into the output tile."""
    def kernel(x_ref, o_ref):
        # All offsets/widths are Python constants -> plain static slices.
        for out_start, src_start, width in groups:
            o_ref[:, out_start:out_start + width] = (
                x_ref[:, src_start:src_start + width])
    return kernel


def make_index_nn_input(which_ind, *, min_pallas_bytes=2 * 1024 * 1024):
    """Builds a callable equivalent to IndexNNInput(which_ind).forward."""
    which_ind = np.asarray(which_ind).reshape(-1).astype(np.int64)
    num_out = int(which_ind.shape[0])
    if num_out == 0:
        raise ValueError("which_ind must be non-empty")

    def forward(x):
        if x.ndim != 2:
            raise ValueError("IndexNNInput expects x of shape (batch, features)")
        batch, feat = x.shape

        # Normalize negative indices (PyTorch semantics) and bounds-check
        # statically — VMEM access has no runtime bounds checking.
        wi = np.where(which_ind < 0, which_ind + feat, which_ind)
        if wi.min() < 0 or wi.max() >= feat:
            raise ValueError(
                f"which_ind out of range for {feat} features: {which_ind}")

        itemsize = jnp.dtype(x.dtype).itemsize
        total_bytes = batch * (feat + num_out) * itemsize

        # Tiny gathers: pallas_call fixed overhead dominates — let XLA fuse it.
        if total_bytes < min_pallas_bytes:
            return x[:, jnp.asarray(wi, dtype=jnp.int32)]

        sublane = _sublane_multiple(itemsize)
        tile_budget, vmem_limit = _vmem_budget_bytes()
        tile_b = _pick_batch_tile(batch, feat, num_out, itemsize, sublane,
                                  tile_budget)
        grid = (pl.cdiv(batch, tile_b),)
        groups = _contiguous_groups(wi)

        return pl.pallas_call(
            _make_gather_kernel(groups),
            out_shape=jax.ShapeDtypeStruct((batch, num_out), x.dtype),
            grid=grid,
            in_specs=[pl.BlockSpec((tile_b, feat), lambda i: (i, 0))],
            out_specs=pl.BlockSpec((tile_b, num_out), lambda i: (i, 0)),
            compiler_params=pltpu.CompilerParams(
                dimension_semantics=("parallel",),
                vmem_limit_bytes=vmem_limit,
            ),
            cost_estimate=pl.CostEstimate(
                flops=0, transcendentals=0, bytes_accessed=total_bytes),
        )(x)

    return jax.jit(forward)


if __name__ == "__main__":
    key = jax.random.PRNGKey(0)
    which_ind = np.array([3, 17, 0, 31, 8, 8, 25, 5], dtype=np.int32)
    idx_j = jnp.asarray(which_ind)

    # Force the Pallas path even at demo sizes (the default threshold would
    # route tiny inputs to plain XLA indexing).
    index_nn = make_index_nn_input(which_ind, min_pallas_bytes=0)

    # 1) Main case: >= 2 parallel batch tiles (megacore-shardable grid).
    batch, feat = 128, 32
    x = jax.random.normal(key, (batch, feat), dtype=jnp.float32)
    out = jax.block_until_ready(index_nn(x))
    ref = x[:, idx_j]
    assert out.shape == (batch, len(which_ind)), out.shape
    assert out.dtype == x.dtype
    np.testing.assert_array_equal(np.asarray(out), np.asarray(ref))

    # 2) Ragged batch (not a multiple of 8): partial last block via pl.cdiv grid.
    x_r = jax.random.normal(jax.random.PRNGKey(0), (100, feat), dtype=jnp.float32)
    out_r = jax.block_until_ready(index_nn(x_r))
    np.testing.assert_array_equal(np.asarray(out_r), np.asarray(x_r[:, idx_j]))

    # 3) Tiny batch (< 8 rows): single full-array block.
    x_s = jax.random.normal(jax.random.PRNGKey(0), (4, feat), dtype=jnp.float32)
    out_s = jax.block_until_ready(index_nn(x_s))
    np.testing.assert_array_equal(np.asarray(out_s), np.asarray(x_s[:, idx_j]))

    # 4) Integer dtype: the gather kernel is a pure copy (no float restriction).
    x_i = jax.random.randint(jax.random.PRNGKey(0), (64, feat), -1000, 1000,
                             dtype=jnp.int32)
    out_i = jax.block_until_ready(index_nn(x_i))
    np.testing.assert_array_equal(np.asarray(out_i), np.asarray(x_i[:, idx_j]))

    # 5) Default threshold: tiny inputs route to the plain XLA gather path.
    index_nn_auto = make_index_nn_input(which_ind)
    out_auto = jax.block_until_ready(index_nn_auto(x))
    np.testing.assert_array_equal(np.asarray(out_auto), np.asarray(ref))

    print("KERNEL_OK")
</pallas_src>

<mosaic_0001>
module attributes {stable_mosaic.version = 11 : i64} {
  func.func @kernel(%arg0: i32, %arg1: memref<64x32xf32, #tpu.memory_space<vmem>>, %arg2: memref<64x8xf32, #tpu.memory_space<vmem>>) attributes {dimension_semantics = [#tpu.dimension_semantics<parallel>], iteration_bounds = array<i64: 2>, scalar_prefetch = 0 : i64, scratch_operands = 0 : i64, tpu.core_type = #tpu.core_type<tc>, window_params = [{transform_indices = @transform_0, window_bounds = array<i64: 64, 32>}, {transform_indices = @transform_1, window_bounds = array<i64: 64, 8>}]} {
    %c0 = arith.constant 0 : index
    %c3 = arith.constant 3 : index
    %0 = vector.load %arg1[%c0, %c3] : memref<64x32xf32, #tpu.memory_space<vmem>>, vector<64x1xf32>
    %c0_0 = arith.constant 0 : index
    %c0_1 = arith.constant 0 : index
    %1 = vector.load %arg2[%c0_0, %c0_1] : memref<64x8xf32, #tpu.memory_space<vmem>>, vector<64x1xf32>
    tpu.vector_store %arg2[%c0_0, %c0_1], %0 {strides = array<i32>} : memref<64x8xf32, #tpu.memory_space<vmem>>, vector<64x1xf32>,
    %c0_2 = arith.constant 0 : index
    %c17 = arith.constant 17 : index
    %2 = vector.load %arg1[%c0_2, %c17] : memref<64x32xf32, #tpu.memory_space<vmem>>, vector<64x1xf32>
    %c0_3 = arith.constant 0 : index
    %c1 = arith.constant 1 : index
    %3 = vector.load %arg2[%c0_3, %c1] : memref<64x8xf32, #tpu.memory_space<vmem>>, vector<64x1xf32>
    tpu.vector_store %arg2[%c0_3, %c1], %2 {strides = array<i32>} : memref<64x8xf32, #tpu.memory_space<vmem>>, vector<64x1xf32>,
    %c0_4 = arith.constant 0 : index
    %c0_5 = arith.constant 0 : index
    %4 = vector.load %arg1[%c0_4, %c0_5] : memref<64x32xf32, #tpu.memory_space<vmem>>, vector<64x1xf32>
    %c0_6 = arith.constant 0 : index
    %c2 = arith.constant 2 : index
    %5 = vector.load %arg2[%c0_6, %c2] : memref<64x8xf32, #tpu.memory_space<vmem>>, vector<64x1xf32>
    tpu.vector_store %arg2[%c0_6, %c2], %4 {strides = array<i32>} : memref<64x8xf32, #tpu.memory_space<vmem>>, vector<64x1xf32>,
    %c0_7 = arith.constant 0 : index
    %c31 = arith.constant 31 : index
    %6 = vector.load %arg1[%c0_7, %c31] : memref<64x32xf32, #tpu.memory_space<vmem>>, vector<64x1xf32>
    %c0_8 = arith.constant 0 : index
    %c3_9 = arith.constant 3 : index
    %7 = vector.load %arg2[%c0_8, %c3_9] : memref<64x8xf32, #tpu.memory_space<vmem>>, vector<64x1xf32>
    tpu.vector_store %arg2[%c0_8, %c3_9], %6 {strides = array<i32>} : memref<64x8xf32, #tpu.memory_space<vmem>>, vector<64x1xf32>,
    %c0_10 = arith.constant 0 : index
    %c8 = arith.constant 8 : index
    %8 = vector.load %arg1[%c0_10, %c8] : memref<64x32xf32, #tpu.memory_space<vmem>>, vector<64x1xf32>
    %c0_11 = arith.constant 0 : index
    %c4 = arith.constant 4 : index
    %9 = vector.load %arg2[%c0_11, %c4] : memref<64x8xf32, #tpu.memory_space<vmem>>, vector<64x1xf32>
    tpu.vector_store %arg2[%c0_11, %c4], %8 {strides = array<i32>} : memref<64x8xf32, #tpu.memory_space<vmem>>, vector<64x1xf32>,
    %c0_12 = arith.constant 0 : index
    %c8_13 = arith.constant 8 : index
    %10 = vector.load %arg1[%c0_12, %c8_13] : memref<64x32xf32, #tpu.memory_space<vmem>>, vector<64x1xf32>
    %c0_14 = arith.constant 0 : index
    %c5 = arith.constant 5 : index
    %11 = vector.load %arg2[%c0_14, %c5] : memref<64x8xf32, #tpu.memory_space<vmem>>, vector<64x1xf32>
    tpu.vector_store %arg2[%c0_14, %c5], %10 {strides = array<i32>} : memref<64x8xf32, #tpu.memory_space<vmem>>, vector<64x1xf32>,
    %c0_15 = arith.constant 0 : index
    %c25 = arith.constant 25 : index
    %12 = vector.load %arg1[%c0_15, %c25] : memref<64x32xf32, #tpu.memory_space<vmem>>, vector<64x1xf32>
    %c0_16 = arith.constant 0 : index
    %c6 = arith.constant 6 : index
    %13 = vector.load %arg2[%c0_16, %c6] : memref<64x8xf32, #tpu.memory_space<vmem>>, vector<64x1xf32>
    tpu.vector_store %arg2[%c0_16, %c6], %12 {strides = array<i32>} : memref<64x8xf32, #tpu.memory_space<vmem>>, vector<64x1xf32>,
    %c0_17 = arith.constant 0 : index
    %c5_18 = arith.constant 5 : index
    %14 = vector.load %arg1[%c0_17, %c5_18] : memref<64x32xf32, #tpu.memory_space<vmem>>, vector<64x1xf32>
    %c0_19 = arith.constant 0 : index
    %c7 = arith.constant 7 : index
    %15 = vector.load %arg2[%c0_19, %c7] : memref<64x8xf32, #tpu.memory_space<vmem>>, vector<64x1xf32>
    tpu.vector_store %arg2[%c0_19, %c7], %14 {strides = array<i32>} : memref<64x8xf32, #tpu.memory_space<vmem>>, vector<64x1xf32>,
    return
  }
  func.func @transform_0(%arg0: i32) -> (i32, i32) {
    %c0_i32 = arith.constant 0 : i32
    %c0_i32_0 = arith.constant 0 : i32
    return %arg0, %c0_i32 : i32, i32
  }
  func.func @transform_1(%arg0: i32) -> (i32, i32) {
    %c0_i32 = arith.constant 0 : i32
    %c0_i32_0 = arith.constant 0 : i32
    return %arg0, %c0_i32 : i32, i32
  }
}

</mosaic_0001>

<bundles_post_ra>
// kernel: forward.1
= control target key start
LH: loop header
LB: loop body
LE: loop exit
PB: predicated region body
PF: predicated region fallthrough
CT: control target
= control target key end

     0   :  { %s617_s6 = smov 0   ;;  %s883_s0 = inlined_call_operand.vmem [shape: f32[128,32], index: 0, kind: input, shape index: {}]   ;;  %s884_s1 = inlined_call_operand.vmem [shape: f32[128,8], index: 1, kind: output, shape index: {}]  }
   0x1 LB: > { %s568_s7 = sadd.s32 4294967295, %s599_s6   ;;  %p572_p0 = scmp.ge.s32.totalorder %s599_s6, 1  ;;  %s599_s6 = sphi %s617_s6, %s11_s6  }
   0x2   : > { %p88_p1 = scmp.lt.s32.totalorder %s599_s6, 3 }
   0x4   : > { %p89_p2 = pnand %p572_p0, %p88_p1 }
   0x5   : > { %s573_s8 = sshll.u32 (!%p89_p2), %s568_s7, 3  ;;  %s601_s13 = smov (!%p89_p2), 125  }
   0x6   : > { %92 = sbr.rel (%p89_p2) target bundleno = 299 (0x12b), region = 24  ;;  %p109_p3 = scmp.lt.s32.totalorder (!%p89_p2), %s573_s8, 15 }
   0x7   : > { %s602_s14 = smov (!%p89_p2), 112   ;;  %s603_s15 = smov (!%p89_p2), 2  }
   0x8   : > { %s604_s16 = smov (!%p89_p2), 100   ;;  %s605_s17 = smov (!%p89_p2), 124  }
   0x9   : > { %s606_s21 = smov (!%p89_p2), 109  }
   0xb   : > { %s886_s8 = smov (!%p109_p3, %s573_s8), 15  ;;  %vm160_vm0 = vcmask 7168   ;;  %vm209_vm1 = vcmask 15368   ;;  %vm258_vm2 = vcmask 23568   ;;  %vm307_vm3 = vcmask 31768  }
   0xc   : > { %s574_s9 = sshll.u32 %s886_s8, 3  ;;  %vm356_vm4 = vcmask 39968   ;;  %vm405_vm5 = vcmask 48168   ;;  %vm454_vm6 = vcmask 56368   ;;  %vm503_vm7 = vcmask 64568  }
   0xd   : > { %s112_s12 = scalar_lea.vmem %s883_s0, %s574_s9  ;;  %s706_s20 = scalar_lea.vmem %s884_s1, %s574_s9 }
   0xe   : > { %v633_v0 = vld [vmem:[%s112_s12] sm:$0xff]  ;;  %v635_v1 = vld [vmem:[%s112_s12 + $0x10] sm:$0xff]  ;;  %v645_v3 = vld [vmem:[%s112_s12 + $0x8] sm:$0xff] }
   0xf   : > { %136 = vrot.lane.b32.xlu0 %v633_v0, %s601_s13  ;;  %140 = vrot.lane.b32.xlu1 %v635_v1, %s601_s13  ;;  %v641_v2 = vld [vmem:[%s112_s12 + $0x20] sm:$0xff]  ;;  %v647_v4 = vld [vmem:[%s112_s12 + $0x18] sm:$0xff] }
  0x10   : > { %144 = vrot.lane.b32.xlu2 %v641_v2, %s601_s13  ;;  %v649_v5 = vld [vmem:[%s112_s12 + $0x28] sm:$0xff]  ;;  %v657_v6 = vld [vmem:[%s112_s12 + $0x30] sm:$0xff]  ;;  %v659_v7 = vld [vmem:[%s112_s12 + $0x38] sm:$0xff] }
  0x17   : > { %138 = vrot.lane.b32.xlu0 %v645_v3, %s601_s13  ;;  %142 = vrot.lane.b32.xlu1 %v647_v4, %s601_s13 }
  0x18   : > { %146 = vrot.lane.b32.xlu2 %v649_v5, %s601_s13 }
  0x1f   : > { %148 = vrot.lane.b32.xlu0 %v657_v6, %s601_s13  ;;  %150 = vrot.lane.b32.xlu1 %v659_v7, %s601_s13 }
  0x20   : > { %185 = vrot.lane.b32.xlu2 %v633_v0, %s602_s14 }
  0x27   : > { %187 = vrot.lane.b32.xlu0 %v645_v3, %s602_s14  ;;  %189 = vrot.lane.b32.xlu1 %v635_v1, %s602_s14 }
  0x28   : > { %191 = vrot.lane.b32.xlu2 %v647_v4, %s602_s14 }
  0x2f   : > { %193 = vrot.lane.b32.xlu0 %v641_v2, %s602_s14  ;;  %195 = vrot.lane.b32.xlu1 %v649_v5, %s602_s14 }
  0x30   : > { %197 = vrot.lane.b32.xlu2 %v657_v6, %s602_s14 }
  0x37   : > { %199 = vrot.lane.b32.xlu0 %v659_v7, %s602_s14  ;;  %234 = vrot.lane.b32.xlu1 %v633_v0, %s603_s15 }
  0x38   : > { %236 = vrot.lane.b32.xlu2 %v645_v3, %s603_s15 }
  0x3f   : > { %238 = vrot.lane.b32.xlu0 %v635_v1, %s603_s15  ;;  %240 = vrot.lane.b32.xlu1 %v647_v4, %s603_s15 }
  0x40   : > { %242 = vrot.lane.b32.xlu2 %v641_v2, %s603_s15 }
  0x47   : > { %244 = vrot.lane.b32.xlu0 %v649_v5, %s603_s15  ;;  %246 = vrot.lane.b32.xlu1 %v657_v6, %s603_s15 }
  0x48   : > { %248 = vrot.lane.b32.xlu2 %v659_v7, %s603_s15 }
  0x4f   : > { %283 = vrot.lane.b32.xlu0 %v633_v0, %s604_s16  ;;  %285 = vrot.lane.b32.xlu1 %v645_v3, %s604_s16 }
  0x50   : > { %287 = vrot.lane.b32.xlu2 %v635_v1, %s604_s16 }
  0x57   : > { %289 = vrot.lane.b32.xlu0 %v647_v4, %s604_s16  ;;  %291 = vrot.lane.b32.xlu1 %v641_v2, %s604_s16 }
  0x58   : > { %293 = vrot.lane.b32.xlu2 %v649_v5, %s604_s16 }
  0x5f   : > { %295 = vrot.lane.b32.xlu0 %v657_v6, %s604_s16  ;;  %297 = vrot.lane.b32.xlu1 %v659_v7, %s604_s16 }
  0x60   : > { %332 = vrot.lane.b32.xlu2 %v633_v0, %s605_s17 }
  0x67   : > { %334 = vrot.lane.b32.xlu0 %v645_v3, %s605_s17  ;;  %336 = vrot.lane.b32.xlu1 %v635_v1, %s605_s17 }
  0x68   : > { %338 = vrot.lane.b32.xlu2 %v647_v4, %s605_s17 }
  0x6a   : > { %v145_v8 = vpop.permute.xlu2 %144 }
  0x6b   : > { %165 = vst.msk [vmem:[%s706_s20 + $0x20] sm:$0xff] %vm160_vm0, %v145_v8 }
  0x6f   : > { %340 = vrot.lane.b32.xlu0 %v641_v2, %s605_s17  ;;  %342 = vrot.lane.b32.xlu1 %v649_v5, %s605_s17 }
  0x70   : > { %344 = vrot.lane.b32.xlu2 %v657_v6, %s605_s17 }
  0x72   : > { %v147_v9 = vpop.permute.xlu2 %146 }
  0x73   : > { %166 = vst.msk [vmem:[%s706_s20 + $0x28] sm:$0xff] %vm160_vm0, %v147_v9 }
  0x77   : > { %346 = vrot.lane.b32.xlu0 %v659_v7, %s605_s17  ;;  %381 = vrot.lane.b32.xlu1 %v633_v0, %s601_s13 }
  0x78   : > { %383 = vrot.lane.b32.xlu2 %v645_v3, %s601_s13 }
  0x7a   : > { %v186_v10 = vpop.permute.xlu2 %185 }
  0x7f   : > { %385 = vrot.lane.b32.xlu0 %v635_v1, %s601_s13  ;;  %387 = vrot.lane.b32.xlu1 %v647_v4, %s601_s13 }
  0x80   : > { %389 = vrot.lane.b32.xlu2 %v641_v2, %s601_s13 }
  0x81   : > { %v137_v11 = vpop.permute.xlu0 %136  ;;  %v141_v12 = vpop.permute.xlu1 %140 }
  0x82   : > { %161 = vst.msk [vmem:[%s706_s20] sm:$0xff] %vm160_vm0, %v137_v11  ;;  %v192_v13 = vpop.permute.xlu2 %191 }
  0x83   : > { %163 = vst.msk [vmem:[%s706_s20 + $0x10] sm:$0xff] %vm160_vm0, %v141_v12 }
  0x84   : > { %210 = vst.msk [vmem:[%s706_s20] sm:$0xff] %vm209_vm1, %v186_v10 }
  0x87   : > { %391 = vrot.lane.b32.xlu0 %v649_v5, %s601_s13  ;;  %393 = vrot.lane.b32.xlu1 %v657_v6, %s601_s13 }
  0x88   : > { %395 = vrot.lane.b32.xlu2 %v659_v7, %s601_s13 }
  0x89   : > { %v139_v14 = vpop.permute.xlu0 %138  ;;  %v143_v15 = vpop.permute.xlu1 %142 }
  0x8a   : > { %162 = vst.msk [vmem:[%s706_s20 + $0x8] sm:$0xff] %vm160_vm0, %v139_v14  ;;  %v198_v16 = vpop.permute.xlu2 %197 }
  0x8b   : > { %164 = vst.msk [vmem:[%s706_s20 + $0x18] sm:$0xff] %vm160_vm0, %v143_v15 }
  0x8c   : > { %213 = vst.msk [vmem:[%s706_s20 + $0x18] sm:$0xff] %vm209_vm1, %v192_v13 }
  0x8f   : > { %430 = vrot.lane.b32.xlu0 %v633_v0, %s606_s21  ;;  %432 = vrot.lane.b32.xlu1 %v645_v3, %s606_s21 }
  0x90   : > { %434 = vrot.lane.b32.xlu2 %v635_v1, %s606_s21 }
  0x91   : > { %v149_v17 = vpop.permute.xlu0 %148  ;;  %v151_v18 = vpop.permute.xlu1 %150 }
  0x92   : > { %167 = vst.msk [vmem:[%s706_s20 + $0x30] sm:$0xff] %vm160_vm0, %v149_v17  ;;  %v237_v19 = vpop.permute.xlu2 %236 }
  0x93   : > { %168 = vst.msk [vmem:[%s706_s20 + $0x38] sm:$0xff] %vm160_vm0, %v151_v18 }
  0x94   : > { %216 = vst.msk [vmem:[%s706_s20 + $0x30] sm:$0xff] %vm209_vm1, %v198_v16 }
  0x97   : > { %436 = vrot.lane.b32.xlu0 %v647_v4, %s606_s21  ;;  %438 = vrot.lane.b32.xlu1 %v641_v2, %s606_s21 }
  0x98   : > { %440 = vrot.lane.b32.xlu2 %v649_v5, %s606_s21 }
  0x99   : > { %v188_v20 = vpop.permute.xlu0 %187  ;;  %v190_v21 = vpop.permute.xlu1 %189 }
  0x9a   : > { %211 = vst.msk [vmem:[%s706_s20 + $0x8] sm:$0xff] %vm209_vm1, %v188_v20  ;;  %v243_v22 = vpop.permute.xlu2 %242 }
  0x9b   : > { %212 = vst.msk [vmem:[%s706_s20 + $0x10] sm:$0xff] %vm209_vm1, %v190_v21 }
  0x9c   : > { %260 = vst.msk [vmem:[%s706_s20 + $0x8] sm:$0xff] %vm258_vm2, %v237_v19 }
  0x9f   : > { %442 = vrot.lane.b32.xlu0 %v657_v6, %s606_s21  ;;  %444 = vrot.lane.b32.xlu1 %v659_v7, %s606_s21 }
  0xa0   : > { %479 = vrot.lane.b32.xlu2 %v633_v0, %s603_s15 }
  0xa1   : > { %v194_v23 = vpop.permute.xlu0 %193  ;;  %v196_v24 = vpop.permute.xlu1 %195 }
  0xa2   : > { %214 = vst.msk [vmem:[%s706_s20 + $0x20] sm:$0xff] %vm209_vm1, %v194_v23  ;;  %v249_v25 = vpop.permute.xlu2 %248 }
  0xa3   : > { %215 = vst.msk [vmem:[%s706_s20 + $0x28] sm:$0xff] %vm209_vm1, %v196_v24 }
  0xa4   : > { %263 = vst.msk [vmem:[%s706_s20 + $0x20] sm:$0xff] %vm258_vm2, %v243_v22 }
  0xa7   : > { %481 = vrot.lane.b32.xlu0 %v645_v3, %s603_s15  ;;  %483 = vrot.lane.b32.xlu1 %v635_v1, %s603_s15 }
  0xa8   : > { %485 = vrot.lane.b32.xlu2 %v647_v4, %s603_s15 }
  0xa9   : > { %v200_v26 = vpop.permute.xlu0 %199  ;;  %v235_v27 = vpop.permute.xlu1 %234 }
  0xaa   : > { %217 = vst.msk [vmem:[%s706_s20 + $0x38] sm:$0xff] %vm209_vm1, %v200_v26  ;;  %v288_v28 = vpop.permute.xlu2 %287 }
  0xab   : > { %259 = vst.msk [vmem:[%s706_s20] sm:$0xff] %vm258_vm2, %v235_v27 }
  0xac   : > { %266 = vst.msk [vmem:[%s706_s20 + $0x38] sm:$0xff] %vm258_vm2, %v249_v25 }
  0xaf   : > { %487 = vrot.lane.b32.xlu0 %v641_v2, %s603_s15  ;;  %489 = vrot.lane.b32.xlu1 %v649_v5, %s603_s15 }
  0xb0   : > { %491 = vrot.lane.b32.xlu2 %v657_v6, %s603_s15 }
  0xb1   : > { %v239_v29 = vpop.permute.xlu0 %238  ;;  %v241_v30 = vpop.permute.xlu1 %240 }
  0xb2   : > { %261 = vst.msk [vmem:[%s706_s20 + $0x10] sm:$0xff] %vm258_vm2, %v239_v29  ;;  %v294_v31 = vpop.permute.xlu2 %293 }
  0xb3   : > { %262 = vst.msk [vmem:[%s706_s20 + $0x18] sm:$0xff] %vm258_vm2, %v241_v30 }
  0xb4   : > { %310 = vst.msk [vmem:[%s706_s20 + $0x10] sm:$0xff] %vm307_vm3, %v288_v28 }
  0xb7   : > { %493 = vrot.lane.b32.xlu0 %v659_v7, %s603_s15 }
  0xb9   : > { %v245_v32 = vpop.permute.xlu0 %244  ;;  %v247_v33 = vpop.permute.xlu1 %246 }
  0xba   : > { %264 = vst.msk [vmem:[%s706_s20 + $0x28] sm:$0xff] %vm258_vm2, %v245_v32  ;;  %v333_v34 = vpop.permute.xlu2 %332 }
  0xbb   : > { %265 = vst.msk [vmem:[%s706_s20 + $0x30] sm:$0xff] %vm258_vm2, %v247_v33 }
  0xbc   : > { %313 = vst.msk [vmem:[%s706_s20 + $0x28] sm:$0xff] %vm307_vm3, %v294_v31 }
  0xc1   : > { %v284_v35 = vpop.permute.xlu0 %283  ;;  %v286_v36 = vpop.permute.xlu1 %285 }
  0xc2   : > { %308 = vst.msk [vmem:[%s706_s20] sm:$0xff] %vm307_vm3, %v284_v35  ;;  %v339_v37 = vpop.permute.xlu2 %338 }
  0xc3   : > { %309 = vst.msk [vmem:[%s706_s20 + $0x8] sm:$0xff] %vm307_vm3, %v286_v36 }
  0xc4   : > { %357 = vst.msk [vmem:[%s706_s20] sm:$0xff] %vm356_vm4, %v333_v34 }
  0xc9   : > { %v290_v38 = vpop.permute.xlu0 %289  ;;  %v292_v39 = vpop.permute.xlu1 %291 }
  0xca   : > { %311 = vst.msk [vmem:[%s706_s20 + $0x18] sm:$0xff] %vm307_vm3, %v290_v38  ;;  %v345_v40 = vpop.permute.xlu2 %344 }
  0xcb   : > { %312 = vst.msk [vmem:[%s706_s20 + $0x20] sm:$0xff] %vm307_vm3, %v292_v39 }
  0xcc   : > { %360 = vst.msk [vmem:[%s706_s20 + $0x18] sm:$0xff] %vm356_vm4, %v339_v37 }
  0xd1   : > { %v296_v41 = vpop.permute.xlu0 %295  ;;  %v298_v42 = vpop.permute.xlu1 %297 }
  0xd2   : > { %314 = vst.msk [vmem:[%s706_s20 + $0x30] sm:$0xff] %vm307_vm3, %v296_v41  ;;  %v384_v43 = vpop.permute.xlu2 %383 }
  0xd3   : > { %315 = vst.msk [vmem:[%s706_s20 + $0x38] sm:$0xff] %vm307_vm3, %v298_v42 }
  0xd4   : > { %363 = vst.msk [vmem:[%s706_s20 + $0x30] sm:$0xff] %vm356_vm4, %v345_v40 }
  0xd9   : > { %v335_v44 = vpop.permute.xlu0 %334  ;;  %v337_v45 = vpop.permute.xlu1 %336 }
  0xda   : > { %358 = vst.msk [vmem:[%s706_s20 + $0x8] sm:$0xff] %vm356_vm4, %v335_v44  ;;  %v390_v46 = vpop.permute.xlu2 %389 }
  0xdb   : > { %359 = vst.msk [vmem:[%s706_s20 + $0x10] sm:$0xff] %vm356_vm4, %v337_v45 }
  0xdc   : > { %407 = vst.msk [vmem:[%s706_s20 + $0x8] sm:$0xff] %vm405_vm5, %v384_v43 }
  0xe1   : > { %v341_v47 = vpop.permute.xlu0 %340  ;;  %v343_v48 = vpop.permute.xlu1 %342 }
  0xe2   : > { %361 = vst.msk [vmem:[%s706_s20 + $0x20] sm:$0xff] %vm356_vm4, %v341_v47  ;;  %v396_v49 = vpop.permute.xlu2 %395 }
  0xe3   : > { %362 = vst.msk [vmem:[%s706_s20 + $0x28] sm:$0xff] %vm356_vm4, %v343_v48 }
  0xe4   : > { %410 = vst.msk [vmem:[%s706_s20 + $0x20] sm:$0xff] %vm405_vm5, %v390_v46 }
  0xe9   : > { %v347_v50 = vpop.permute.xlu0 %346  ;;  %v382_v51 = vpop.permute.xlu1 %381 }
  0xea   : > { %364 = vst.msk [vmem:[%s706_s20 + $0x38] sm:$0xff] %vm356_vm4, %v347_v50  ;;  %v435_v52 = vpop.permute.xlu2 %434 }
  0xeb   : > { %406 = vst.msk [vmem:[%s706_s20] sm:$0xff] %vm405_vm5, %v382_v51 }
  0xec   : > { %413 = vst.msk [vmem:[%s706_s20 + $0x38] sm:$0xff] %vm405_vm5, %v396_v49 }
  0xf1   : > { %v386_v53 = vpop.permute.xlu0 %385  ;;  %v388_v54 = vpop.permute.xlu1 %387 }
  0xf2   : > { %408 = vst.msk [vmem:[%s706_s20 + $0x10] sm:$0xff] %vm405_vm5, %v386_v53  ;;  %v441_v55 = vpop.permute.xlu2 %440 }
  0xf3   : > { %409 = vst.msk [vmem:[%s706_s20 + $0x18] sm:$0xff] %vm405_vm5, %v388_v54 }
  0xf4   : > { %457 = vst.msk [vmem:[%s706_s20 + $0x10] sm:$0xff] %vm454_vm6, %v435_v52 }
  0xf9   : > { %v392_v56 = vpop.permute.xlu0 %391  ;;  %v394_v57 = vpop.permute.xlu1 %393 }
  0xfa   : > { %411 = vst.msk [vmem:[%s706_s20 + $0x28] sm:$0xff] %vm405_vm5, %v392_v56  ;;  %v480_v58 = vpop.permute.xlu2 %479 }
  0xfb   : > { %412 = vst.msk [vmem:[%s706_s20 + $0x30] sm:$0xff] %vm405_vm5, %v394_v57 }
  0xfc   : > { %460 = vst.msk [vmem:[%s706_s20 + $0x28] sm:$0xff] %vm454_vm6, %v441_v55 }
 0x101   : > { %v431_v59 = vpop.permute.xlu0 %430  ;;  %v433_v60 = vpop.permute.xlu1 %432 }
 0x102   : > { %455 = vst.msk [vmem:[%s706_s20] sm:$0xff] %vm454_vm6, %v431_v59  ;;  %v486_v61 = vpop.permute.xlu2 %485 }
 0x103   : > { %456 = vst.msk [vmem:[%s706_s20 + $0x8] sm:$0xff] %vm454_vm6, %v433_v60 }
 0x104   : > { %504 = vst.msk [vmem:[%s706_s20] sm:$0xff] %vm503_vm7, %v480_v58 }
 0x109   : > { %v437_v62 = vpop.permute.xlu0 %436  ;;  %v439_v63 = vpop.permute.xlu1 %438 }
 0x10a   : > { %458 = vst.msk [vmem:[%s706_s20 + $0x18] sm:$0xff] %vm454_vm6, %v437_v62  ;;  %v492_v0 = vpop.permute.xlu2 %491 }
 0x10b   : > { %459 = vst.msk [vmem:[%s706_s20 + $0x20] sm:$0xff] %vm454_vm6, %v439_v63 }
 0x10c   : > { %507 = vst.msk [vmem:[%s706_s20 + $0x18] sm:$0xff] %vm503_vm7, %v486_v61 }
 0x111   : > { %v443_v1 = vpop.permute.xlu0 %442  ;;  %v445_v2 = vpop.permute.xlu1 %444 }
 0x112   : > { %461 = vst.msk [vmem:[%s706_s20 + $0x30] sm:$0xff] %vm454_vm6, %v443_v1 }
 0x113   : > { %462 = vst.msk [vmem:[%s706_s20 + $0x38] sm:$0xff] %vm454_vm6, %v445_v2 }
 0x114   : > { %510 = vst.msk [vmem:[%s706_s20 + $0x30] sm:$0xff] %vm503_vm7, %v492_v0 }
 0x119   : > { %v482_v3 = vpop.permute.xlu0 %481  ;;  %v484_v4 = vpop.permute.xlu1 %483 }
 0x11a   : > { %505 = vst.msk [vmem:[%s706_s20 + $0x8] sm:$0xff] %vm503_vm7, %v482_v3 }
 0x11b   : > { %506 = vst.msk [vmem:[%s706_s20 + $0x10] sm:$0xff] %vm503_vm7, %v484_v4 }
 0x121   : > { %v488_v5 = vpop.permute.xlu0 %487  ;;  %v490_v6 = vpop.permute.xlu1 %489 }
 0x122   : > { %508 = vst.msk [vmem:[%s706_s20 + $0x20] sm:$0xff] %vm503_vm7, %v488_v5 }
 0x123   : > { %509 = vst.msk [vmem:[%s706_s20 + $0x28] sm:$0xff] %vm503_vm7, %v490_v6 }
 0x129   : > { %v494_v7 = vpop.permute.xlu0 %493 }
 0x12a   : > { %511 = vst.msk [vmem:[%s706_s20 + $0x38] sm:$0xff] %vm503_vm7, %v494_v7 }
 0x12b PF: > { %s11_s6 = sadd.s32 1, %s599_s6  }
 0x12c   : > { %p8_p4 = scmp.ge.s32.totalorder %s11_s6, 4  }
 0x12e   :  { %10 = sbr.rel (!%p8_p4) target bundleno = 1 (0x1), region = 54 }

</bundles_post_ra>
